<compile_context>
chip_gen: v7x
topology: tpu7x:2x2x1
jax: 0.10.0
libtpu: 0.0.40
codegen_flags: <defaults>
</compile_context>

<pallas_src>
import math
import functools

import jax
import jax.numpy as jnp
from jax.experimental import pallas as pl
from jax.experimental.pallas import tpu as pltpu


# Tile preferences: 512x512 tiles (bf16 inputs, f32 outputs).
_TM_PREF = 512    # output-row tile (rows of x / adj / out)
_TN_PREF = 512    # output-column tile (F_out)
_TK_PREF = 512    # contraction tile (F_in, or N for adj @ XW)

_VMEM_LIMIT_BYTES = 32 * 1024 * 1024     # safe on v5e/v6e/v7x
_RESIDENT_B_BYTES = 4 * 1024 * 1024      # hold XW fully resident if <= this


def _round_up(x, m):
    return ((x + m - 1) // m) * m


def _pad_axis(dim, pref, align):
    """Return (padded_dim, tile). Small dims -> single full-extent tile."""
    if dim <= pref:
        p = _round_up(dim, align)
        return p, p
    p = _round_up(dim, pref)
    return p, pref


def _pad2(arr, rows, cols):
    r, c = arr.shape
    if r == rows and c == cols:
        return arr                       # skip the HBM round trip entirely
    return jnp.pad(arr, ((0, rows - r), (0, cols - c)))


def _itemsize(dtype):
    return 2 if dtype == jnp.bfloat16 else 4


# ------------------------------ kernels ------------------------------------


def _mm_acc_kernel(a_ref, b_ref, o_ref, acc_ref):
    """o = a @ b with an f32 scratch accumulator (for narrow output dtypes)."""
    k = pl.program_id(2)

    @pl.when(k == 0)
    def _init():
        acc_ref[...] = jnp.zeros_like(acc_ref)

    acc_ref[...] += jnp.dot(a_ref[...], b_ref[...],
                            preferred_element_type=jnp.float32)

    @pl.when(k == pl.num_programs(2) - 1)
    def _finalize():
        o_ref[...] = acc_ref[...].astype(o_ref.dtype)


def _mm_bias_kernel(a_ref, b_ref, bias_ref, o_ref):
    """o(f32) = a @ b + bias, accumulating directly into the resident o tile."""
    k = pl.program_id(2)

    @pl.when(k == 0)
    def _init():
        o_ref[...] = jnp.broadcast_to(bias_ref[...], o_ref.shape).astype(o_ref.dtype)

    o_ref[...] += jnp.dot(a_ref[...], b_ref[...],
                          preferred_element_type=jnp.float32)


def _mm_bias_resident_b_kernel(a_ref, b_ref, bias_ref, o_ref, *, tk, tn):
    """Like _mm_bias_kernel, but the full B (= XW) is DMA'd once and held
    resident in VMEM; the (tk, tn) sub-block is sliced in-kernel."""
    j = pl.program_id(1)
    k = pl.program_id(2)

    @pl.when(k == 0)
    def _init():
        o_ref[...] = jnp.broadcast_to(bias_ref[...], o_ref.shape).astype(o_ref.dtype)

    b_blk = b_ref[pl.ds(pl.multiple_of(k * tk, tk), tk),
                  pl.ds(pl.multiple_of(j * tn, tn), tn)]
    o_ref[...] += jnp.dot(a_ref[...], b_blk,
                          preferred_element_type=jnp.float32)


# ---------------------------- tiled matmul ----------------------------------


def _tiled_matmul(a, b, bias, *, tm, tn, tk, out_dtype, resident_b=False):
    """C = a @ b (+ bias). Shapes must already be padded to tile multiples."""
    m, kdim = a.shape
    kb, ncol = b.shape
    assert kdim == kb and m % tm == 0 and ncol % tn == 0 and kdim % tk == 0
    grid = (m // tm, ncol // tn, kdim // tk)

    a_spec = pl.BlockSpec((tm, tk), lambda i, j, kk: (i, kk))
    if resident_b:
        # Full XW held in VMEM for the whole kernel: fetched exactly once.
        b_spec = pl.BlockSpec((kdim, ncol), lambda i, j, kk: (0, 0))
    else:
        b_spec = pl.BlockSpec((tk, tn), lambda i, j, kk: (kk, j))
    out_spec = pl.BlockSpec((tm, tn), lambda i, j, kk: (i, j))

    in_specs = [a_spec, b_spec]
    if bias is None:
        assert not resident_b
        kernel = _mm_acc_kernel
        scratch = [pltpu.VMEM((tm, tn), jnp.float32)]
        args = (a, b)
    else:
        in_specs.append(pl.BlockSpec((1, tn), lambda i, j, kk: (0, j)))
        scratch = []
        args = (a, b, bias)
        if resident_b:
            kernel = functools.partial(_mm_bias_resident_b_kernel, tk=tk, tn=tn)
        else:
            kernel = _mm_bias_kernel

    flops = 2 * m * ncol * kdim
    bytes_accessed = (m * kdim * _itemsize(a.dtype)
                      + kdim * ncol * _itemsize(b.dtype)
                      + m * ncol * _itemsize(out_dtype)
                      + (ncol * 4 if bias is not None else 0))

    return pl.pallas_call(
        kernel,
        out_shape=jax.ShapeDtypeStruct((m, ncol), out_dtype),
        grid_spec=pltpu.PrefetchScalarGridSpec(
            num_scalar_prefetch=0,
            grid=grid,
            in_specs=in_specs,
            out_specs=out_spec,
            scratch_shapes=scratch,
        ),
        compiler_params=pltpu.CompilerParams(
            dimension_semantics=("parallel", "parallel", "arbitrary"),
            vmem_limit_bytes=_VMEM_LIMIT_BYTES),
        cost_estimate=pl.CostEstimate(flops=flops, transcendentals=0,
                                      bytes_accessed=bytes_accessed),
    )(*args)


# ------------------------------ forward -------------------------------------


@functools.partial(jax.jit, static_argnames=("eye",))
def snowball_layer_forward(x, adj, weight, bias, *, eye=False):
    """Pallas equivalent of snowball_layer.forward(input, adj, eye)."""
    n, f_in = x.shape
    f_out = weight.shape[1]

    # Padded extents + tile sizes (16-row alignment for bf16 sublane packing,
    # 128-lane alignment for lane-dense output/contraction dims).
    n_p, t_n = _pad_axis(n, _TM_PREF, 16)
    fin_p, t_fin = _pad_axis(f_in, _TK_PREF, 128)
    fout_p, t_fout = _pad_axis(f_out, _TN_PREF, 128)

    # bf16 streamed operands; cast precedes any pad so materialized copies are
    # half size.  Accumulation + bias add stay f32 inside the kernels.
    x_p = _pad2(x.astype(jnp.bfloat16), n_p, fin_p)
    w_p = _pad2(weight.astype(jnp.bfloat16), fin_p, fout_p)
    b_p = _pad2(bias.astype(jnp.float32).reshape(1, f_out), 1, fout_p)

    if eye:
        # out = X @ W + bias (f32 accumulate directly into the output tile).
        out_p = _tiled_matmul(x_p, w_p, b_p, tm=t_n, tn=t_fout, tk=t_fin,
                              out_dtype=jnp.float32)
    else:
        # TODO(synk): torch.spmm's sparse-COO adjacency path has no sparse
        # Pallas equivalent here; adjacency is handled as a dense (N, N) matrix.
        adj_p = _pad2(adj.astype(jnp.bfloat16), n_p, n_p)
        # Stage 1: XW = X @ W once, stored bf16 so the HBM-bound stage 2 reads
        # half the bytes (f32 scratch accumulator inside).
        xw_p = _tiled_matmul(x_p, w_p, None, tm=t_n, tn=t_fout, tk=t_fin,
                             out_dtype=jnp.bfloat16)
        # Stage 2: adj @ XW + bias.  Hold XW fully resident in VMEM when it
        # fits (fetched once), otherwise stream it tile-by-tile.
        resident = (n_p * fout_p * 2) <= _RESIDENT_B_BYTES
        out_p = _tiled_matmul(adj_p, xw_p, b_p, tm=t_n, tn=t_fout, tk=t_n,
                              out_dtype=jnp.float32, resident_b=resident)

    if n_p == n and fout_p == f_out:
        return out_p
    return out_p[:n, :f_out]


def init_snowball_params(key, in_features, out_features):
    """Matches reset_parameters(): uniform(-1/sqrt(F_out), 1/sqrt(F_out))."""
    kw, kb = jax.random.split(key)
    stdv = 1.0 / math.sqrt(out_features)
    weight = jax.random.uniform(kw, (in_features, out_features), jnp.float32,
                                minval=-stdv, maxval=stdv)
    bias = jax.random.uniform(kb, (out_features,), jnp.float32,
                              minval=-stdv, maxval=stdv)
    return weight, bias


if __name__ == "__main__":
    key = jax.random.PRNGKey(0)

    def run_case(case_key, n, f_in, f_out):
        k_x, k_adj, k_p = jax.random.split(case_key, 3)
        x = jax.random.normal(k_x, (n, f_in), jnp.float32)
        a = jax.random.uniform(k_adj, (n, n), jnp.float32)
        adj = (a + a.T) / (2.0 * n)      # dense normalized-ish adjacency
        weight, bias = init_snowball_params(k_p, f_in, f_out)

        out = snowball_layer_forward(x, adj, weight, bias, eye=False)
        out_eye = snowball_layer_forward(x, adj, weight, bias, eye=True)
        jax.block_until_ready((out, out_eye))

        hi = jax.lax.Precision.HIGHEST
        xw = jnp.dot(x, weight, precision=hi)
        ref = jnp.dot(adj, xw, precision=hi) + bias[None, :]
        ref_eye = xw + bias[None, :]
        assert out.shape == (n, f_out) and out_eye.shape == (n, f_out)
        # bf16 streamed operands + f32 accumulate: loosened tolerances.
        assert jnp.allclose(out, ref, atol=1e-2, rtol=2e-2), \
            f"mismatch (eye=False) at N={n}"
        assert jnp.allclose(out_eye, ref_eye, atol=1e-2, rtol=2e-2), \
            f"mismatch (eye=True) at N={n}"

    k1, k2, k3 = jax.random.split(key, 3)
    # Small demo shape consistent with the module (16 nodes, 32 -> 32 features).
    run_case(k1, n=16, f_in=32, f_out=32)
    # Non-aligned single-tile shape exercising padding and lane-dense output.
    run_case(k2, n=384, f_in=200, f_out=96)
    # Multi-tile shape exercising the 3-D grid, the resident-XW stage-2 path,
    # and direct f32 accumulation into the output tile across K steps.
    run_case(k3, n=1088, f_in=64, f_out=128)

    print("KERNEL_OK")
</pallas_src>

<mosaic_0001>
module attributes {stable_mosaic.version = 11 : i64} {
  func.func @_mm_bias_resident_b_kernel(%arg0: i32, %arg1: i32, %arg2: i32, %arg3: memref<16x16xbf16, #tpu.memory_space<vmem>>, %arg4: memref<16x128xbf16, #tpu.memory_space<vmem>>, %arg5: memref<1x128xf32, #tpu.memory_space<vmem>>, %arg6: memref<16x128xf32, #tpu.memory_space<vmem>>) attributes {dimension_semantics = [#tpu.dimension_semantics<parallel>, #tpu.dimension_semantics<parallel>, #tpu.dimension_semantics<arbitrary>], iteration_bounds = array<i64: 1, 1, 1>, scalar_prefetch = 0 : i64, scratch_operands = 0 : i64, tpu.core_type = #tpu.core_type<tc>, window_params = [{transform_indices = @transform_0, window_bounds = array<i64: 16, 16>}, {pipeline_mode = #tpu.pipeline_mode<synchronous>, transform_indices = @transform_1, window_bounds = array<i64: 16, 128>}, {transform_indices = @transform_2, window_bounds = array<i64: 1, 128>}, {transform_indices = @transform_3, window_bounds = array<i64: 16, 128>}]} {
    %c0_i32 = arith.constant 0 : i32
    %0 = arith.cmpi eq, %arg2, %c0_i32 : i32
    %1 = arith.extui %0 : i1 to i32
    %c0_i32_0 = arith.constant 0 : i32
    %2 = arith.cmpi ne, %1, %c0_i32_0 : i32
    scf.if %2 {
      %c0_6 = arith.constant 0 : index
      %c0_7 = arith.constant 0 : index
      %15 = vector.load %arg5[%c0_6, %c0_7] : memref<1x128xf32, #tpu.memory_space<vmem>>, vector<1x128xf32>
      %16 = vector.shape_cast %15 : vector<1x128xf32> to vector<1x128xf32>
      %17 = vector.broadcast %16 : vector<1x128xf32> to vector<16x128xf32>
      %c0_8 = arith.constant 0 : index
      %c0_9 = arith.constant 0 : index
      %18 = vector.load %arg6[%c0_8, %c0_9] : memref<16x128xf32, #tpu.memory_space<vmem>>, vector<16x128xf32>
      tpu.vector_store %arg6[%c0_8, %c0_9], %17 {strides = array<i32>} : memref<16x128xf32, #tpu.memory_space<vmem>>, vector<16x128xf32>,
    } else {
    }
    %c16_i32 = arith.constant 16 : i32
    %3 = arith.muli %arg2, %c16_i32 : i32
    %4 = tpu.assume_multiple %3, 16 : i32
    %c128_i32 = arith.constant 128 : i32
    %5 = arith.muli %arg1, %c128_i32 : i32
    %6 = tpu.assume_multiple %5, 128 : i32
    %7 = arith.index_cast %4 : i32 to index
    %8 = arith.index_cast %6 : i32 to index
    %9 = vector.load %arg4[%7, %8] : memref<16x128xbf16, #tpu.memory_space<vmem>>, vector<16x128xbf16>
    %c0 = arith.constant 0 : index
    %c0_1 = arith.constant 0 : index
    %10 = vector.load %arg6[%c0, %c0_1] : memref<16x128xf32, #tpu.memory_space<vmem>>, vector<16x128xf32>
    %c0_2 = arith.constant 0 : index
    %c0_3 = arith.constant 0 : index
    %11 = vector.load %arg3[%c0_2, %c0_3] : memref<16x16xbf16, #tpu.memory_space<vmem>>, vector<16x16xbf16>
    %cst = arith.constant dense<0.000000e+00> : vector<16x128xf32>
    %12 = tpu.matmul %11, %9, %cst {dimension_numbers = #tpu.dot_dimension_numbers<[1], [0], [0], [1], [0, 0, 1, 1], [], []>} : vector<16x16xbf16>, vector<16x128xbf16>, vector<16x128xf32> -> vector<16x128xf32>
    %13 = arith.addf %10, %12 : vector<16x128xf32>
    %c0_4 = arith.constant 0 : index
    %c0_5 = arith.constant 0 : index
    %14 = vector.load %arg6[%c0_4, %c0_5] : memref<16x128xf32, #tpu.memory_space<vmem>>, vector<16x128xf32>
    tpu.vector_store %arg6[%c0_4, %c0_5], %13 {strides = array<i32>} : memref<16x128xf32, #tpu.memory_space<vmem>>, vector<16x128xf32>,
    return
  }
  func.func @transform_0(%arg0: i32, %arg1: i32, %arg2: i32) -> (i32, i32) {
    %c0_i32 = arith.constant 0 : i32
    return %arg0, %arg2 : i32, i32
  }
  func.func @transform_1(%arg0: i32, %arg1: i32, %arg2: i32) -> (i32, i32) {
    %c0_i32 = arith.constant 0 : i32
    %c0_i32_0 = arith.constant 0 : i32
    %c0_i32_1 = arith.constant 0 : i32
    return %c0_i32, %c0_i32_0 : i32, i32
  }
  func.func @transform_2(%arg0: i32, %arg1: i32, %arg2: i32) -> (i32, i32) {
    %c0_i32 = arith.constant 0 : i32
    %c0_i32_0 = arith.constant 0 : i32
    return %c0_i32, %arg1 : i32, i32
  }
  func.func @transform_3(%arg0: i32, %arg1: i32, %arg2: i32) -> (i32, i32) {
    %c0_i32 = arith.constant 0 : i32
    return %arg0, %arg1 : i32, i32
  }
}

module attributes {stable_mosaic.version = 11 : i64} {
  func.func @_mm_acc_kernel(%arg0: i32, %arg1: i32, %arg2: i32, %arg3: memref<16x128xbf16, #tpu.memory_space<vmem>>, %arg4: memref<128x128xbf16, #tpu.memory_space<vmem>>, %arg5: memref<16x128xbf16, #tpu.memory_space<vmem>>, %arg6: memref<16x128xf32, #tpu.memory_space<vmem>>) attributes {dimension_semantics = [#tpu.dimension_semantics<parallel>, #tpu.dimension_semantics<parallel>, #tpu.dimension_semantics<arbitrary>], iteration_bounds = array<i64: 1, 1, 1>, scalar_prefetch = 0 : i64, scratch_operands = 1 : i64, tpu.core_type = #tpu.core_type<tc>, window_params = [{transform_indices = @transform_0, window_bounds = array<i64: 16, 128>}, {transform_indices = @transform_1, window_bounds = array<i64: 128, 128>}, {transform_indices = @transform_2, window_bounds = array<i64: 16, 128>}]} {
    %c0_i32 = arith.constant 0 : i32
    %0 = arith.cmpi eq, %arg2, %c0_i32 : i32
    %1 = arith.extui %0 : i1 to i32
    %c0_i32_0 = arith.constant 0 : i32
    %2 = arith.cmpi ne, %1, %c0_i32_0 : i32
    scf.if %2 {
      %cst_10 = arith.constant 0.000000e+00 : f32
      %12 = vector.broadcast %cst_10 : f32 to vector<16x128xf32>
      %c0_11 = arith.constant 0 : index
      %c0_12 = arith.constant 0 : index
      %13 = vector.load %arg6[%c0_11, %c0_12] : memref<16x128xf32, #tpu.memory_space<vmem>>, vector<16x128xf32>
      tpu.vector_store %arg6[%c0_11, %c0_12], %12 {strides = array<i32>} : memref<16x128xf32, #tpu.memory_space<vmem>>, vector<16x128xf32>,
    } else {
    }
    %c0 = arith.constant 0 : index
    %c0_1 = arith.constant 0 : index
    %3 = vector.load %arg6[%c0, %c0_1] : memref<16x128xf32, #tpu.memory_space<vmem>>, vector<16x128xf32>
    %c0_2 = arith.constant 0 : index
    %c0_3 = arith.constant 0 : index
    %4 = vector.load %arg3[%c0_2, %c0_3] : memref<16x128xbf16, #tpu.memory_space<vmem>>, vector<16x128xbf16>
    %c0_4 = arith.constant 0 : index
    %c0_5 = arith.constant 0 : index
    %5 = vector.load %arg4[%c0_4, %c0_5] : memref<128x128xbf16, #tpu.memory_space<vmem>>, vector<128x128xbf16>
    %cst = arith.constant dense<0.000000e+00> : vector<16x128xf32>
    %6 = tpu.matmul %4, %5, %cst {dimension_numbers = #tpu.dot_dimension_numbers<[1], [0], [0], [1], [0, 0, 1, 1], [], []>} : vector<16x128xbf16>, vector<128x128xbf16>, vector<16x128xf32> -> vector<16x128xf32>
    %7 = arith.addf %3, %6 : vector<16x128xf32>
    %c0_6 = arith.constant 0 : index
    %c0_7 = arith.constant 0 : index
    %8 = vector.load %arg6[%c0_6, %c0_7] : memref<16x128xf32, #tpu.memory_space<vmem>>, vector<16x128xf32>
    tpu.vector_store %arg6[%c0_6, %c0_7], %7 {strides = array<i32>} : memref<16x128xf32, #tpu.memory_space<vmem>>, vector<16x128xf32>,
    %c0_i32_8 = arith.constant 0 : i32
    %9 = arith.cmpi eq, %arg2, %c0_i32_8 : i32
    %10 = arith.extui %9 : i1 to i32
    %c0_i32_9 = arith.constant 0 : i32
    %11 = arith.cmpi ne, %10, %c0_i32_9 : i32
    scf.if %11 {
      %c0_10 = arith.constant 0 : index
      %c0_11 = arith.constant 0 : index
      %12 = vector.load %arg6[%c0_10, %c0_11] : memref<16x128xf32, #tpu.memory_space<vmem>>, vector<16x128xf32>
      %13 = arith.truncf %12 : vector<16x128xf32> to vector<16x128xbf16>
      %c0_12 = arith.constant 0 : index
      %c0_13 = arith.constant 0 : index
      %14 = vector.load %arg5[%c0_12, %c0_13] : memref<16x128xbf16, #tpu.memory_space<vmem>>, vector<16x128xbf16>
      tpu.vector_store %arg5[%c0_12, %c0_13], %13 {strides = array<i32>} : memref<16x128xbf16, #tpu.memory_space<vmem>>, vector<16x128xbf16>,
    } else {
    }
    return
  }
  func.func @transform_0(%arg0: i32, %arg1: i32, %arg2: i32) -> (i32, i32) {
    %c0_i32 = arith.constant 0 : i32
    return %arg0, %arg2 : i32, i32
  }
  func.func @transform_1(%arg0: i32, %arg1: i32, %arg2: i32) -> (i32, i32) {
    %c0_i32 = arith.constant 0 : i32
    return %arg2, %arg1 : i32, i32
  }
  func.func @transform_2(%arg0: i32, %arg1: i32, %arg2: i32) -> (i32, i32) {
    %c0_i32 = arith.constant 0 : i32
    return %arg0, %arg1 : i32, i32
  }
}

</mosaic_0001>

<bundles_post_ra>
// kernel: snowball_layer_forward.2
= control target key start
LH: loop header
LB: loop body
LE: loop exit
PB: predicated region body
PF: predicated region fallthrough
CT: control target
= control target key end

     0   :  { %v214_v0 = vmov 0.0   ;;  %vm215_vm0 = vmmov 0   ;;  %s261_s1 = inlined_call_operand.vmem [shape: bf16[128,128], index: 1, kind: input, shape index: {}]   ;;  %s262_s0 = inlined_call_operand.vmem [shape: bf16[16,128], index: 0, kind: input, shape index: {}]   ;;  %s263_s2 = inlined_call_operand.vmem [shape: bf16[16,128], index: 2, kind: output, shape index: {}]  }
   0x1   :  { %183 = vmatprep.subr.bf16.mxu0 %v214_v0  ;;  %v205_v1 = vld [vmem:[%s261_s1] sm:$0xff]   ;;  %199 = vmatprep.mubr.msk.bf16.mxu0 %vm215_vm0, %v214_v0  ;;  %v206_v2 = vld [vmem:[%s261_s1 + $0x8] sm:$0xff]   ;;  %v207_v3 = vld [vmem:[%s261_s1 + $0x10] sm:$0xff]  }
   0x2   :  { %184 = vmatpush3.bf16.msra.mxu0 %v205_v1  ;;  %v208_v4 = vld [vmem:[%s261_s1 + $0x18] sm:$0xff]   ;;  %v209_v5 = vld [vmem:[%s261_s1 + $0x20] sm:$0xff]   ;;  %v210_v6 = vld [vmem:[%s261_s1 + $0x28] sm:$0xff]  }
   0x3   :  { %185 = vmatprep.subr.bf16.mxu0 %v214_v0  ;;  %v211_v7 = vld [vmem:[%s261_s1 + $0x30] sm:$0xff]   ;;  %v212_v8 = vld [vmem:[%s261_s1 + $0x38] sm:$0xff]   ;;  %v213_v9 = vld [vmem:[%s262_s0] sm:$0xff]  }
   0x6   :  { %186 = vmatpush3.bf16.msra.mxu0 %v206_v2 }
   0x7   :  { %187 = vmatprep.subr.bf16.mxu0 %v214_v0 }
   0xa   :  { %188 = vmatpush3.bf16.msra.mxu0 %v207_v3 }
   0xb   :  { %189 = vmatprep.subr.bf16.mxu0 %v214_v0 }
   0xe   :  { %190 = vmatpush3.bf16.msra.mxu0 %v208_v4 }
   0xf   :  { %191 = vmatprep.subr.bf16.mxu0 %v214_v0 }
  0x12   :  { %192 = vmatpush3.bf16.msra.mxu0 %v209_v5 }
  0x13   :  { %193 = vmatprep.subr.bf16.mxu0 %v214_v0 }
  0x16   :  { %194 = vmatpush3.bf16.msra.mxu0 %v210_v6 }
  0x17   :  { %195 = vmatprep.subr.bf16.mxu0 %v214_v0 }
  0x1a   :  { %196 = vmatpush3.bf16.msra.mxu0 %v211_v7 }
  0x1b   :  { %197 = vmatprep.subr.bf16.mxu0 %v214_v0 }
  0x1e   :  { %198 = vmatpush3.bf16.msra.mxu0 %v212_v8 }
  0x21   :  { %200 = vmatmul.mubr.bf16.vlgmr.msra.gmra.mrb[0].mxu0 %v213_v9 }
  0xf4   :  { %v126_v10 = vpop.f32.mrb[0].mxu0 }
  0xf5   :  { %v201_v11 = vpop.f32.mrb[1].mxu0 }
  0xf6   :  { %v129_v12 = vpop.f32.mrb[2].mxu0 }
  0xf7   :  { %v172_v13 = vpack.c.bf16 %v129_v12, %v126_v10  ;;  %v202_v14 = vpop.f32.mrb[3].mxu0 }
  0xf9   :  { %173 = vst [vmem:[%s263_s2] sm:$0xff] %v172_v13  }

// kernel: snowball_layer_forward.3
= control target key start
LH: loop header
LB: loop body
LE: loop exit
PB: predicated region body
PF: predicated region fallthrough
CT: control target
= control target key end

     0   :  { %v166_v1 = vmov 0.0   ;;  %vm167_vm0 = vmmov 0   ;;  %vm55_vm1 = vcmask 130048   ;;  %s212_s0 = inlined_call_operand.vmem [shape: bf16[16,16], index: 0, kind: input, shape index: {}]   ;;  %s213_s1 = inlined_call_operand.vmem [shape: bf16[16,128], index: 1, kind: input, shape index: {}]   ;;  %s214_s2 = inlined_call_operand.vmem [shape: f32[1,128], index: 2, kind: input, shape index: {}]   ;;  %s215_s3 = inlined_call_operand.hbm [shape: f32[16,128], index: 3, kind: output, shape index: {}]  }
   0x1   :  { %v140_v0 = vld [vmem:[%s213_s1] sm:$0xff]   ;;  %129 = vmatprep.subr.bf16.mxu0 %v166_v1  ;;  %131 = vmatprep.mubr.msk.bf16.mxu0 %vm167_vm0, %v166_v1 }
   0x2   :  { %v141_v2 = vld [vmem:[%s212_s0] sm:$0xff]   ;;  %130 = vmatpush3.bf16.msra.mxu0 %v140_v0 }
   0x3   :  { %8 = vsyncpa [#allocation3], 0  ;;  %v123_v3 = vld [vmem:[%s214_s2] ss:$0 sm:$0xff]  ;;  %s168_s18 = smov [#allocation2]  }
   0x4   :  { %s109_s19 = sshll.u32 %s168_s18, 4  ;;  %s110_s19 = int_to_ptr.vmem [resolvable:$true] %s109_s19 }
   0x5   :  { %132 = vmatmul.mubr.msk.bf16.vlgmr.msra.gmra.mrb[0].mxu0 %vm55_vm1, %v141_v2  ;;  %s142_s0 = scalar_lea.vmem %s110_s19, 256  ;;  %p147_p1 = scmp.lt.s32.totalorder %s110_s19, %s110_s19 }
   0x6   :  { %p143_p0 = scmp.ne.s32.totalorder %s110_s19, %s142_s0  ;;  %p148_p2 = scmp.lt.s32.totalorder %s142_s0, %s142_s0 }
   0x8   :  { %p149_p3 = por %p148_p2, %p147_p1 }
   0xa   :  { %p150_p4 = pnand %p149_p3, %p143_p0 }
  0xd8   :  { %v93_v4 = vpop.f32.mrb[0].mxu0 }
  0xd9   :  { %v100_v5 = vadd.f32 %v123_v3, %v93_v4  ;;  %v133_v6 = vpop.f32.mrb[1].mxu0 }
  0xda   :  { %v96_v7 = vpop.f32.mrb[2].mxu0 }
  0xdb   :  { %102 = vst [vmem:[#allocation2] sm:$0xff] %v100_v5  ;;  %v101_v8 = vadd.f32 %v123_v3, %v96_v7  ;;  %v134_v9 = vpop.f32.mrb[3].mxu0 }
  0xdd   :  { %103 = vst [vmem:[#allocation2 + $0x8] sm:$0xff] %v101_v8 }
  0xde   :  { %153 = shalt.err (!%p150_p4)
}
  0xdf   :  { %s154_s20 = scalar_lea.hbm %s215_s3, 256 }
  0xe0   :  { %p155_p5 = scmp.ne.s32.totalorder %s215_s3, %s154_s20  ;;  %p158_p6 = scmp.lt.u32.totalorder %s154_s20, %s215_s3 }
  0xe2   :  { %p160_p7 = pnand %p158_p6, %p155_p5 }
  0xe4   :  { %163 = shalt.err (!%p160_p7)
}
  0xe5   :  { %s169_s25 = smov 128   ;;  %s170_s26 = smov 8  }
  0xe6   :  { %115 = dma.vmem_to_hbm [thread:$0]  %s110_s19, 256, %s215_s3, [#allocation3], %s169_s25, %s169_s25, %s170_s26  }
  0xe7   :  { %164 = dma.done.wait [#allocation3], 256  }
  0xe8   :  { %165 = vsyncadd [#allocation3], 4294967040 }
  0xe9   :  { %119 = vsyncpa [#allocation3], 1 }

</bundles_post_ra>
